<compile_context>
chip_gen: v5e
topology: v5e:2x2
jax: 0.10.0
libtpu: 0.0.40
codegen_flags: <defaults>
</compile_context>

<pallas_src>
import jax
import jax.numpy as jnp
from jax.experimental import pallas as pl
from jax.experimental.pallas import tpu as pltpu


def critic_kernel(x_ref, w1t_ref, b1_ref, w2_ref, b2_ref, o_ref):
    # x_ref: (4, TB)  w1t_ref: (8, 4)  b1_ref: (8, 1)  w2_ref: (8, 1)
    # b2_ref: SMEM (1,)  o_ref: (1, TB)
    # Layer 1 on the MXU: h = W1^T @ x + b1, then ReLU (VPU).
    h = jnp.dot(w1t_ref[...], x_ref[...], preferred_element_type=jnp.float32)  # (8, TB)
    h = jnp.maximum(h + b1_ref[...], 0.0)
    # Layer 2 off the MXU: v[b] = sum_j w2[j] * h[j, b] + b2  (VPU FMA + XLU reduce).
    v = jnp.sum(h * w2_ref[...], axis=0, keepdims=True)                        # (1, TB)
    o_ref[...] = (v + b2_ref[0]).astype(o_ref.dtype)


def critic_forward(x, w1, b1, w2, b2, *, tb=2048):
    """x: (B, 4) f32. w1: (4, 8), b1: (8,), w2: (8, 1), b2: (1,). Returns (B, 1)."""
    B = x.shape[0]
    # Lane tile: multiple of 128; don't over-pad tiny batches.
    tb = min(tb, pl.cdiv(B, 128) * 128)
    b_pad = pl.cdiv(B, tb) * tb
    grid = (b_pad // tb,)

    # Wrapper-side layout plumbing: batch-on-lanes, padded to the tile boundary.
    xt = jnp.pad(x.T.astype(jnp.float32), ((0, 0), (0, b_pad - B)))   # (4, b_pad)
    w1t = w1.T.astype(jnp.float32)                # (8, 4) == PyTorch linear1.weight
    b1c = b1.reshape(8, 1).astype(jnp.float32)    # (8, 1) broadcast over lanes
    w2c = w2.reshape(8, 1).astype(jnp.float32)    # (8, 1)
    b2s = b2.reshape(1).astype(jnp.float32)       # (1,)   scalar, lives in SMEM

    param_bytes = (w1t.size + b1c.size + w2c.size + b2s.size) * 4
    cost = pl.CostEstimate(
        flops=2 * B * (4 * 8 + 8 * 1),
        transcendentals=0,
        bytes_accessed=B * (4 + 1) * 4 + param_bytes,
    )

    out = pl.pallas_call(
        critic_kernel,
        out_shape=jax.ShapeDtypeStruct((1, b_pad), jnp.float32),
        grid=grid,
        in_specs=[
            pl.BlockSpec((4, tb), lambda i: (0, i)),            # x tile, batch on lanes
            pl.BlockSpec((8, 4), lambda i: (0, 0)),             # W1^T resident
            pl.BlockSpec((8, 1), lambda i: (0, 0)),             # b1 resident
            pl.BlockSpec((8, 1), lambda i: (0, 0)),             # w2 resident
            pl.BlockSpec(memory_space=pltpu.MemorySpace.SMEM),  # b2 scalar
        ],
        out_specs=pl.BlockSpec((1, tb), lambda i: (0, i)),      # lane-dense output
        compiler_params=pltpu.CompilerParams(
            dimension_semantics=("parallel",),                  # v7x: shard across 2 TCs
        ),
        cost_estimate=cost,
    )(xt, w1t, b1c, w2c, b2s)

    return out[0, :B].reshape(B, 1)


def init_params(key):
    # Deterministic synthetic init (mimics PyTorch Linear's uniform(-1/sqrt(fan_in), ...)).
    k1, k2, k3, k4 = jax.random.split(key, 4)
    bound1 = 1.0 / jnp.sqrt(4.0)
    bound2 = 1.0 / jnp.sqrt(8.0)
    w1 = jax.random.uniform(k1, (4, 8), jnp.float32, -bound1, bound1)
    b1 = jax.random.uniform(k2, (8,), jnp.float32, -bound1, bound1)
    w2 = jax.random.uniform(k3, (8, 1), jnp.float32, -bound2, bound2)
    b2 = jax.random.uniform(k4, (1,), jnp.float32, -bound2, bound2)
    return w1, b1, w2, b2


def reference_forward(x, w1, b1, w2, b2):
    h = jnp.maximum(x @ w1 + b1, 0.0)
    return h @ w2 + b2


if __name__ == "__main__":
    key = jax.random.PRNGKey(0)
    kx, kp, kx2 = jax.random.split(key, 3)
    w1, b1, w2, b2 = init_params(kp)

    # Small shape consistent with the module: batch=2, state_dim=4.
    x = jax.random.normal(kx, (2, 4), jnp.float32)
    out = jax.block_until_ready(critic_forward(x, w1, b1, w2, b2))
    ref = reference_forward(x, w1, b1, w2, b2)
    assert out.shape == (2, 1)
    assert jnp.allclose(out, ref, atol=1e-5, rtol=1e-5), (out, ref)

    # Also exercise the gridded / ragged-batch path (grid > 1, padding sliced off).
    xb = jax.random.normal(kx2, (300, 4), jnp.float32)
    outb = jax.block_until_ready(critic_forward(xb, w1, b1, w2, b2, tb=128))
    refb = reference_forward(xb, w1, b1, w2, b2)
    assert outb.shape == (300, 1)
    assert jnp.allclose(outb, refb, atol=1e-5, rtol=1e-5)

    print("KERNEL_OK")
</pallas_src>

<mosaic_0001>
module attributes {stable_mosaic.version = 11 : i64} {
  func.func @critic_kernel(%arg0: i32, %arg1: memref<4x128xf32, #tpu.memory_space<vmem>>, %arg2: memref<8x4xf32, #tpu.memory_space<vmem>>, %arg3: memref<8x1xf32, #tpu.memory_space<vmem>>, %arg4: memref<8x1xf32, #tpu.memory_space<vmem>>, %arg5: memref<1xf32, #tpu.memory_space<smem>>, %arg6: memref<1x128xf32, #tpu.memory_space<vmem>>) attributes {dimension_semantics = [#tpu.dimension_semantics<parallel>], iteration_bounds = array<i64: 1>, scalar_prefetch = 0 : i64, scratch_operands = 0 : i64, tpu.core_type = #tpu.core_type<tc>, window_params = [{transform_indices = @transform_0, window_bounds = array<i64: 4, 128>}, {pipeline_mode = #tpu.pipeline_mode<synchronous>, transform_indices = @transform_1, window_bounds = array<i64: 8, 4>}, {pipeline_mode = #tpu.pipeline_mode<synchronous>, transform_indices = @transform_2, window_bounds = array<i64: 8, 1>}, {pipeline_mode = #tpu.pipeline_mode<synchronous>, transform_indices = @transform_3, window_bounds = array<i64: 8, 1>}, {transform_indices = @transform_4, window_bounds = array<i64: 1>}, {transform_indices = @transform_5, window_bounds = array<i64: 1, 128>}]} {
    %c0 = arith.constant 0 : index
    %c0_0 = arith.constant 0 : index
    %0 = vector.load %arg2[%c0, %c0_0] : memref<8x4xf32, #tpu.memory_space<vmem>>, vector<8x4xf32>
    %c0_1 = arith.constant 0 : index
    %c0_2 = arith.constant 0 : index
    %1 = vector.load %arg1[%c0_1, %c0_2] : memref<4x128xf32, #tpu.memory_space<vmem>>, vector<4x128xf32>
    %cst = arith.constant dense<0.000000e+00> : vector<8x128xf32>
    %2 = tpu.matmul %0, %1, %cst {dimension_numbers = #tpu.dot_dimension_numbers<[1], [0], [0], [1], [0, 0, 1, 1], [], []>} : vector<8x4xf32>, vector<4x128xf32>, vector<8x128xf32> -> vector<8x128xf32>
    %c0_3 = arith.constant 0 : index
    %c0_4 = arith.constant 0 : index
    %3 = vector.load %arg3[%c0_3, %c0_4] : memref<8x1xf32, #tpu.memory_space<vmem>>, vector<8x1xf32>
    %4 = vector.broadcast %3 : vector<8x1xf32> to vector<8x128xf32>
    %5 = arith.addf %2, %4 : vector<8x128xf32>
    %cst_5 = arith.constant 0.000000e+00 : f32
    %6 = vector.broadcast %cst_5 : f32 to vector<8x128xf32>
    %7 = arith.maximumf %5, %6 : vector<8x128xf32>
    %c0_6 = arith.constant 0 : index
    %c0_7 = arith.constant 0 : index
    %8 = vector.load %arg4[%c0_6, %c0_7] : memref<8x1xf32, #tpu.memory_space<vmem>>, vector<8x1xf32>
    %9 = vector.broadcast %8 : vector<8x1xf32> to vector<8x128xf32>
    %10 = arith.mulf %7, %9 : vector<8x128xf32>
    %cst_8 = arith.constant dense<0.000000e+00> : vector<128xf32>
    %11 = vector.multi_reduction <add>, %10, %cst_8 [0] : vector<8x128xf32> to vector<128xf32>
    %12 = vector.shape_cast %11 : vector<128xf32> to vector<1x128xf32>
    %c0_9 = arith.constant 0 : index
    %13 = memref.load %arg5[%c0_9] : memref<1xf32, #tpu.memory_space<smem>>
    %14 = vector.broadcast %13 : f32 to vector<1x128xf32>
    %15 = arith.addf %12, %14 : vector<1x128xf32>
    %c0_10 = arith.constant 0 : index
    %c0_11 = arith.constant 0 : index
    %16 = vector.load %arg6[%c0_10, %c0_11] : memref<1x128xf32, #tpu.memory_space<vmem>>, vector<1x128xf32>
    tpu.vector_store %arg6[%c0_10, %c0_11], %15 {strides = array<i32>} : memref<1x128xf32, #tpu.memory_space<vmem>>, vector<1x128xf32>,
    return
  }
  func.func @transform_0(%arg0: i32) -> (i32, i32) {
    %c0_i32 = arith.constant 0 : i32
    %c0_i32_0 = arith.constant 0 : i32
    return %c0_i32, %arg0 : i32, i32
  }
  func.func @transform_1(%arg0: i32) -> (i32, i32) {
    %c0_i32 = arith.constant 0 : i32
    %c0_i32_0 = arith.constant 0 : i32
    %c0_i32_1 = arith.constant 0 : i32
    return %c0_i32, %c0_i32_0 : i32, i32
  }
  func.func @transform_2(%arg0: i32) -> (i32, i32) {
    %c0_i32 = arith.constant 0 : i32
    %c0_i32_0 = arith.constant 0 : i32
    %c0_i32_1 = arith.constant 0 : i32
    return %c0_i32, %c0_i32_0 : i32, i32
  }
  func.func @transform_3(%arg0: i32) -> (i32, i32) {
    %c0_i32 = arith.constant 0 : i32
    %c0_i32_0 = arith.constant 0 : i32
    %c0_i32_1 = arith.constant 0 : i32
    return %c0_i32, %c0_i32_0 : i32, i32
  }
  func.func @transform_4(%arg0: i32) -> i32 {
    %c0_i32 = arith.constant 0 : i32
    %c0_i32_0 = arith.constant 0 : i32
    return %c0_i32 : i32
  }
  func.func @transform_5(%arg0: i32) -> (i32, i32) {
    %c0_i32 = arith.constant 0 : i32
    %c0_i32_0 = arith.constant 0 : i32
    return %c0_i32, %arg0 : i32, i32
  }
}

</mosaic_0001>

<bundles_post_ra>
// kernel: tpu_custom_call.1
= control target key start
LH: loop header
LB: loop body
LE: loop exit
PB: predicated region body
PF: predicated region fallthrough
CT: control target
= control target key end

     0   :  { %vm34_vm0 = vcmask 1043456   ;;  %v123_v3 = vmov 0   ;;  %vm30_vm1 = vcmask 31744   ;;  %s173_s0 = inlined_call_operand.vmem [shape: f32[4,128], index: 0, kind: input, shape index: {}]   ;;  %s174_s1 = inlined_call_operand.vmem [shape: f32[8,4], index: 1, kind: input, shape index: {}]   ;;  %s175_s2 = inlined_call_operand.vmem [shape: f32[8,1], index: 2, kind: input, shape index: {}]   ;;  %s176_s3 = inlined_call_operand.vmem [shape: f32[8,1], index: 3, kind: input, shape index: {}]   ;;  %s177_s4 = inlined_call_operand.<no memory space> [shape: f32[1], index: 4, kind: input, shape index: {}]   ;;  %s178_s5 = inlined_call_operand.hbm [shape: f32[1,128], index: 5, kind: output, shape index: {}]  }
   0x1   :  { %v23_v0 = vld [vmem:[%s173_s0] sm:$0xf]  ;;  %96 = vset.pattern.permute.xlu0 %v123_v3 }
   0x2   :  { %v24_v1 = vld [vmem:[%s175_s2] sm:$0xff]  ;;  %92 = vmatpush.msk.msra.mxu0 %vm34_vm0, %v23_v0 }
   0x3   :  { %v22_v2 = vld [vmem:[%s174_s1] sm:$0xff] }
   0x4   :  { %11 = vsyncpa [#allocation4], 0  ;;  %27 = vperm.xlu0 %96, %v24_v1   ;;  %93 = vmatmul.msk.f32.vlgmr.msra.gmra.mxu0 %vm30_vm1, %v22_v2  ;;  %v59_v4 = vld [vmem:[%s176_s3] sm:$0xff]  ;;  %v73_v16 = vstv %s177_s4  ;;  %s124_s2 = smov [#allocation3]   ;;  %s83_s28 = sshll.u32 %s178_s5, 4  ;;  %s84_s28 = int_to_ptr.hbm [resolvable:$true] %s83_s28 }
   0x5   :  { %s81_s26 = sshll.u32 %s124_s2, 4  ;;  %s82_s26 = int_to_ptr.vmem [resolvable:$true] %s81_s26 }
   0xc   :  { %62 = vperm.xlu0 %96, %v59_v4  }
  0x76   :  { %v28_v5 = vpop.permute.xlu0 %27 }
  0x7e   :  { %v63_v9 = vpop.permute.xlu0 %62 }
  0x81   :  { %v55_v6 = vpop.f32.mrf.mxu0 }
  0x82   :  { %v56_v7 = vadd.f32 %v55_v6, %v28_v5 }
  0x84   :  { %v58_v8 = vmax.f32 %v56_v7, 0.0 }
  0x86   :  { %v65_v10 = vmul.f32 %v63_v9, %v58_v8 }
  0x88   :  { %v66_v11 = vrot.slane %v65_v10, 4 }
  0x8a   :  { %v67_v12 = vadd.f32 %v66_v11, %v65_v10 }
  0x8c   :  { %v68_v13 = vrot.slane %v67_v12, 2 }
  0x8e   :  { %v69_v14 = vadd.f32 %v68_v13, %v67_v12 }
  0x90   :  { %v70_v15 = vrot.slane %v69_v14, 1 }
  0x92   :  { %v71_v17 = vadd.f32 %v70_v15, %v69_v14 }
  0x94   :  { %v74_v18 = vadd.f32 %v73_v16, %v71_v17 }
  0x96   :  { %75 = vst [vmem:[#allocation3] sm:$0x1] %v74_v18 }
  0x97   :  { %86 = dma.vmem_to_hbm [thread:$0]  %s82_s26, 16, %s84_s28, [#allocation4]  }
  0x98   :  { %121 = dma.done.wait [#allocation4], 16  }
  0x99   :  { %122 = vsyncadd [#allocation4], 4294967280 }
  0x9a   :  { %91 = vsyncpa [#allocation4], 1 }

</bundles_post_ra>
